<compile_context>
chip_gen: v7x
topology: tpu7x:2x2x1
jax: 0.10.0
libtpu: 0.0.40
codegen_flags: <defaults>
</compile_context>

<pallas_src>
import functools
import math

import jax
import jax.numpy as jnp
from jax.experimental import pallas as pl
from jax.experimental.pallas import tpu as pltpu

Z_DIM = 32
R = 1.0  # TODO(synk): `r` is undefined in the reference forward; fixed to 1.0 here.

_HALF_LN_2PI = 0.5 * math.log(2.0 * math.pi)


def _lgamma_stirling(z):
    """log(Gamma(z)) via Stirling's asymptotic series.

    Accurate to <1e-7 absolute for z >= ~8; here z = (d-1)/2 + kappa >= 15.5
    for d = 32 and kappa >= 0 (no guard for kappa <= -(d-1)/2 + 8).  Cheap on
    the VPU (a handful of mul/adds) plus one EUP log and one reciprocal, and
    has no f32 overflow for large kappa (unlike the rational Lanczos form).
    """
    r = 1.0 / z
    r2 = r * r
    series = r * (1.0 / 12.0 - r2 * (1.0 / 360.0 - r2 * (1.0 / 1260.0)))
    return (z - 0.5) * jnp.log(z) - z + _HALF_LN_2PI + series


def _kldirac_kernel(mu_ref, wc_ref, kappa_ref, out_ref, *, d):
    mu = mu_ref[...].astype(jnp.float32)        # (tb, d)
    wc = wc_ref[...].astype(jnp.float32)        # (tb, d)
    kappa = kappa_ref[...].astype(jnp.float32)  # (1, tb)  lane-dense
    tb = kappa.shape[1]

    beta = (d - 1) / 2.0
    ln2 = math.log(2.0)
    ln_pi = math.log(math.pi)
    const = d / 2.0 * math.log(2.0 * math.pi) + d * math.log(R)

    # cos_theta lane-dense via the (otherwise idle) MXU: contract the (tb, d)
    # elementwise product against a ones matrix so batch lands on the MXU N
    # (lane) dimension -- no XLU transpose / VPU sublane fold needed.
    # precision=HIGHEST keeps the row-dot at f32 accuracy (l3 scales it by kappa).
    prod = mu * wc                               # (tb, d)
    ones_lhs = jnp.ones((8, d), jnp.float32)
    cos8 = jax.lax.dot_general(
        ones_lhs, prod,
        dimension_numbers=(((1,), (1,)), ((), ())),
        preferred_element_type=jnp.float32,
        precision=jax.lax.Precision.HIGHEST)     # (8, tb)
    cos_theta = cos8[0:1, :]                     # (1, tb)

    alpha = beta + kappa                         # (1, tb)
    alpha_pb = alpha + beta                      # (1, tb)

    # lgamma(alpha) and lgamma(alpha + beta) in one stacked lane-dense pass.
    row = jax.lax.broadcasted_iota(jnp.int32, (2, tb), 0).astype(jnp.float32)
    z2 = alpha + row * beta                      # row 0: alpha, row 1: alpha + beta
    lg = _lgamma_stirling(z2)                    # (2, tb)

    l1 = alpha_pb * ln2 + beta * ln_pi
    l2 = lg[0:1, :] - lg[1:2, :]
    # log(1 + cos_theta) matches the PyTorch reference exactly; for nearly
    # antipodal unit vectors (cos_theta -> -1) it goes to -inf, as the reference does.
    l3 = -kappa * jnp.log(1.0 + cos_theta)
    losses = l1 + l2 + l3 + const

    # Single lane-dense (4, tb) store instead of four 1-sublane slice stores.
    out_ref[...] = jnp.concatenate([losses, l1, l2, l3], axis=0)


def kl_dirac_ps(mu, kappa, wc, *, z_dim=Z_DIM, tb=2048):
    """mu, wc: (B, d); kappa: (B, 1).  Returns (losses, l1, l2, l3), each (B, 1) f32.

    mu/wc are streamed in the caller's dtype (bf16 callers: half the HBM
    traffic); the kernel upcasts tiles to f32.  tb is the batch (lane) tile;
    a multiple of 128 in [512, 4096] is a good range, and the wrapper keeps
    >= 4 grid steps when B allows so v7x gets >= 2 steps per TensorCore.
    """
    B, d = mu.shape
    assert d == z_dim
    assert kappa.shape == (B, 1)

    kappa_row = kappa.reshape(1, B)   # free contiguous reshape, batch on lanes

    tb = min(tb, B)
    if B >= 4 * 128:
        tb = min(tb, pl.cdiv(B, 4))   # keep the grid >= 4 steps when possible
    if tb < B:
        tb = max(128, (tb // 128) * 128)   # lane tile must be a multiple of 128
    grid = (pl.cdiv(B, tb),)

    out = pl.pallas_call(
        functools.partial(_kldirac_kernel, d=d),
        grid=grid,
        in_specs=[
            pl.BlockSpec((tb, d), lambda i: (i, 0)),
            pl.BlockSpec((tb, d), lambda i: (i, 0)),
            pl.BlockSpec((1, tb), lambda i: (0, i)),
        ],
        out_specs=pl.BlockSpec((4, tb), lambda i: (0, i)),
        out_shape=jax.ShapeDtypeStruct((4, B), jnp.float32),
        compiler_params=pltpu.CompilerParams(dimension_semantics=("parallel",)),
    )(mu, wc, kappa_row)

    losses, l1, l2, l3 = (out[i].reshape(B, 1) for i in range(4))
    return losses, l1, l2, l3


def _reference(mu, kappa, wc, z_dim=Z_DIM):
    """Pure-JAX reference mirroring the PyTorch forward (gammaln = log(gamma))."""
    from jax.scipy.special import gammaln
    d = z_dim
    beta = (d - 1) / 2.0
    alpha = beta + kappa
    cos_theta = jnp.sum(mu * wc, axis=1, keepdims=True)
    l1 = (alpha + beta) * math.log(2.0) + beta * math.log(math.pi)
    l2 = gammaln(alpha) - gammaln(alpha + beta)
    l3 = -kappa * jnp.log(1.0 + cos_theta)
    losses = l1 + l2 + l3 + d / 2.0 * math.log(2.0 * math.pi) + d * math.log(R)
    return losses, l1, l2, l3


if __name__ == "__main__":
    key = jax.random.PRNGKey(0)
    k1, k2, k3 = jax.random.split(key, 3)

    B, d = 256, Z_DIM
    mu = jax.random.normal(k1, (B, d), jnp.float32)
    mu = mu / jnp.linalg.norm(mu, axis=1, keepdims=True)
    wc = jax.random.normal(k2, (B, d), jnp.float32)
    wc = wc / jnp.linalg.norm(wc, axis=1, keepdims=True)
    kappa = jax.random.uniform(k3, (B, 1), jnp.float32, minval=5.0, maxval=50.0)

    # tb=128 gives a 2-step grid at this small demo size (exercises the
    # pipeline and the megacore-parallel axis); production sizes use tb>=512.
    outs = kl_dirac_ps(mu, kappa, wc, tb=128)
    jax.block_until_ready(outs)

    refs = _reference(mu, kappa, wc)
    for got, want in zip(outs, refs):
        assert got.shape == want.shape
        assert jnp.allclose(got, want, rtol=2e-3, atol=2e-2), (got, want)

    # Native-dtype streaming path: bf16 mu/wc go straight into the kernel
    # (no wrapper upcast); compare against the reference on the same rounded values.
    mu_bf = mu.astype(jnp.bfloat16)
    wc_bf = wc.astype(jnp.bfloat16)
    outs_bf = kl_dirac_ps(mu_bf, kappa, wc_bf, tb=128)
    jax.block_until_ready(outs_bf)
    refs_bf = _reference(mu_bf.astype(jnp.float32), kappa, wc_bf.astype(jnp.float32))
    for got, want in zip(outs_bf, refs_bf):
        assert jnp.allclose(got, want, rtol=2e-3, atol=2e-2), (got, want)

    print("KERNEL_OK")
</pallas_src>

<mosaic_0001>
module attributes {stable_mosaic.version = 11 : i64} {
  func.func @_kldirac_kernel(%arg0: i32, %arg1: memref<128x32xf32, #tpu.memory_space<vmem>>, %arg2: memref<128x32xf32, #tpu.memory_space<vmem>>, %arg3: memref<1x128xf32, #tpu.memory_space<vmem>>, %arg4: memref<4x128xf32, #tpu.memory_space<vmem>>) attributes {dimension_semantics = [#tpu.dimension_semantics<parallel>], iteration_bounds = array<i64: 2>, scalar_prefetch = 0 : i64, scratch_operands = 0 : i64, tpu.core_type = #tpu.core_type<tc>, window_params = [{transform_indices = @transform_0, window_bounds = array<i64: 128, 32>}, {transform_indices = @transform_1, window_bounds = array<i64: 128, 32>}, {transform_indices = @transform_2, window_bounds = array<i64: 1, 128>}, {transform_indices = @transform_3, window_bounds = array<i64: 4, 128>}]} {
    %c0 = arith.constant 0 : index
    %c0_0 = arith.constant 0 : index
    %0 = vector.load %arg1[%c0, %c0_0] : memref<128x32xf32, #tpu.memory_space<vmem>>, vector<128x32xf32>
    %c0_1 = arith.constant 0 : index
    %c0_2 = arith.constant 0 : index
    %1 = vector.load %arg2[%c0_1, %c0_2] : memref<128x32xf32, #tpu.memory_space<vmem>>, vector<128x32xf32>
    %c0_3 = arith.constant 0 : index
    %c0_4 = arith.constant 0 : index
    %2 = vector.load %arg3[%c0_3, %c0_4] : memref<1x128xf32, #tpu.memory_space<vmem>>, vector<1x128xf32>
    %3 = arith.mulf %0, %1 : vector<128x32xf32>
    %cst = arith.constant 1.000000e+00 : f32
    %4 = vector.broadcast %cst : f32 to vector<8x32xf32>
    %cst_5 = arith.constant dense<0.000000e+00> : vector<8x128xf32>
    %5 = tpu.matmul %4, %3, %cst_5 {dimension_numbers = #tpu.dot_dimension_numbers<[1], [1], [0], [0], [0, 0, 1, 0], [], []>, precision = #tpu.contract_precision<fp32>} : vector<8x32xf32>, vector<128x32xf32>, vector<8x128xf32> -> vector<8x128xf32>
    %6 = vector.extract_strided_slice %5 {offsets = [0, 0], sizes = [1, 128], strides = [1, 1]} : vector<8x128xf32> to vector<1x128xf32>
    %cst_6 = arith.constant 1.550000e+01 : f32
    %7 = vector.broadcast %cst_6 : f32 to vector<1x128xf32>
    %8 = arith.addf %7, %2 : vector<1x128xf32>
    %cst_7 = arith.constant 1.550000e+01 : f32
    %9 = vector.broadcast %cst_7 : f32 to vector<1x128xf32>
    %10 = arith.addf %8, %9 : vector<1x128xf32>
    %11 = tpu.iota {dimensions = array<i32: 0>} : vector<2x128xi32>
    %12 = arith.sitofp %11 : vector<2x128xi32> to vector<2x128xf32>
    %cst_8 = arith.constant 1.550000e+01 : f32
    %13 = vector.broadcast %cst_8 : f32 to vector<2x128xf32>
    %14 = arith.mulf %12, %13 : vector<2x128xf32>
    %15 = vector.broadcast %8 : vector<1x128xf32> to vector<2x128xf32>
    %16 = arith.addf %15, %14 : vector<2x128xf32>
    %cst_9 = arith.constant 1.000000e+00 : f32
    %17 = vector.broadcast %cst_9 : f32 to vector<2x128xf32>
    %18 = arith.divf %17, %16 : vector<2x128xf32>
    %19 = arith.mulf %18, %18 : vector<2x128xf32>
    %cst_10 = arith.constant 7.93650805E-4 : f32
    %20 = vector.broadcast %cst_10 : f32 to vector<2x128xf32>
    %21 = arith.mulf %19, %20 : vector<2x128xf32>
    %cst_11 = arith.constant 0.00277777785 : f32
    %22 = vector.broadcast %cst_11 : f32 to vector<2x128xf32>
    %23 = arith.subf %22, %21 : vector<2x128xf32>
    %24 = arith.mulf %19, %23 : vector<2x128xf32>
    %cst_12 = arith.constant 0.0833333358 : f32
    %25 = vector.broadcast %cst_12 : f32 to vector<2x128xf32>
    %26 = arith.subf %25, %24 : vector<2x128xf32>
    %27 = arith.mulf %18, %26 : vector<2x128xf32>
    %cst_13 = arith.constant 5.000000e-01 : f32
    %28 = vector.broadcast %cst_13 : f32 to vector<2x128xf32>
    %29 = arith.subf %16, %28 : vector<2x128xf32>
    %30 = math.log %16 : vector<2x128xf32>
    %31 = arith.mulf %29, %30 : vector<2x128xf32>
    %32 = arith.subf %31, %16 : vector<2x128xf32>
    %cst_14 = arith.constant 0.918938517 : f32
    %33 = vector.broadcast %cst_14 : f32 to vector<2x128xf32>
    %34 = arith.addf %32, %33 : vector<2x128xf32>
    %35 = arith.addf %34, %27 : vector<2x128xf32>
    %cst_15 = arith.constant 0.693147182 : f32
    %36 = vector.broadcast %cst_15 : f32 to vector<1x128xf32>
    %37 = arith.mulf %10, %36 : vector<1x128xf32>
    %cst_16 = arith.constant 17.7433128 : f32
    %38 = vector.broadcast %cst_16 : f32 to vector<1x128xf32>
    %39 = arith.addf %37, %38 : vector<1x128xf32>
    %40 = vector.extract_strided_slice %35 {offsets = [0, 0], sizes = [1, 128], strides = [1, 1]} : vector<2x128xf32> to vector<1x128xf32>
    %41 = vector.extract_strided_slice %35 {offsets = [1, 0], sizes = [1, 128], strides = [1, 1]} : vector<2x128xf32> to vector<1x128xf32>
    %42 = arith.subf %40, %41 : vector<1x128xf32>
    %cst_17 = arith.constant 0.000000e+00 : f32
    %43 = vector.broadcast %cst_17 : f32 to vector<1x128xf32>
    %44 = arith.subf %43, %2 : vector<1x128xf32>
    %cst_18 = arith.constant 1.000000e+00 : f32
    %45 = vector.broadcast %cst_18 : f32 to vector<1x128xf32>
    %46 = arith.addf %45, %6 : vector<1x128xf32>
    %47 = math.log %46 : vector<1x128xf32>
    %48 = arith.mulf %44, %47 : vector<1x128xf32>
    %49 = arith.addf %39, %42 : vector<1x128xf32>
    %50 = arith.addf %49, %48 : vector<1x128xf32>
    %cst_19 = arith.constant 29.4060326 : f32
    %51 = vector.broadcast %cst_19 : f32 to vector<1x128xf32>
    %52 = arith.addf %50, %51 : vector<1x128xf32>
    %53 = tpu.concatenate %52, %39, %42, %48 in 0 : vector<1x128xf32>, vector<1x128xf32>, vector<1x128xf32>, vector<1x128xf32> -> vector<4x128xf32>
    %c0_20 = arith.constant 0 : index
    %c0_21 = arith.constant 0 : index
    %54 = vector.load %arg4[%c0_20, %c0_21] : memref<4x128xf32, #tpu.memory_space<vmem>>, vector<4x128xf32>
    tpu.vector_store %arg4[%c0_20, %c0_21], %53 {strides = array<i32>} : memref<4x128xf32, #tpu.memory_space<vmem>>, vector<4x128xf32>,
    return
  }
  func.func @transform_0(%arg0: i32) -> (i32, i32) {
    %c0_i32 = arith.constant 0 : i32
    %c0_i32_0 = arith.constant 0 : i32
    return %arg0, %c0_i32 : i32, i32
  }
  func.func @transform_1(%arg0: i32) -> (i32, i32) {
    %c0_i32 = arith.constant 0 : i32
    %c0_i32_0 = arith.constant 0 : i32
    return %arg0, %c0_i32 : i32, i32
  }
  func.func @transform_2(%arg0: i32) -> (i32, i32) {
    %c0_i32 = arith.constant 0 : i32
    %c0_i32_0 = arith.constant 0 : i32
    return %c0_i32, %arg0 : i32, i32
  }
  func.func @transform_3(%arg0: i32) -> (i32, i32) {
    %c0_i32 = arith.constant 0 : i32
    %c0_i32_0 = arith.constant 0 : i32
    return %c0_i32, %arg0 : i32, i32
  }
}

</mosaic_0001>

<bundles_post_ra>
// kernel: tpu_custom_call.1
= control target key start
LH: loop header
LB: loop body
LE: loop exit
PB: predicated region body
PF: predicated region fallthrough
CT: control target
= control target key end

     0   :  { %8 = vsyncpa [#allocation3], 0  ;;  %s2119_s0 = inlined_call_operand.vmem [shape: f32[256,32], index: 0, kind: input, shape index: {}]   ;;  %s2120_s1 = inlined_call_operand.vmem [shape: f32[256,32], index: 1, kind: input, shape index: {}]   ;;  %s2121_s2 = inlined_call_operand.vmem [shape: f32[1,256], index: 2, kind: input, shape index: {}]   ;;  %s2122_s3 = inlined_call_operand.hbm [shape: f32[4,256], index: 3, kind: output, shape index: {}]  }
   0x1   :  { %10 = vsyncpa [#allocation3 + $0x1], 0  ;;  %s1720_s12 = smov 0   ;;  %s1722_s13 = smov 0  }
   0x2   :  { %s1724_s14 = smov 0   ;;  %s1726_s15 = smov 0  }
   0x3 LB: > { %s1741_s16 = sadd.s32 4294967295, %s1692_s15   ;;  %s1107_s17 = sadd.s32 4294967294, %s1692_s15   ;;  %s1692_s15 = sphi %s1726_s15, %s2128_s15   ;;  %s1688_s14 = sphi %s1724_s14, %s2127_s14   ;;  %s1684_s13 = sphi %s1722_s13, %s2126_s13   ;;  %s1680_s12 = sphi %s1720_s12, %s2125_s12  }
   0x4   : > { %s1745_s18 = sadd.s32 1, %s1692_s15   ;;  %s101_s19 = sadd.s32 1, %s1688_s14 }
   0x5   : > { %s98_s20 = ssub.s32 %s1692_s15, %s1745_s18  ;;  %p111_p0 = scmp.ne.s32.totalorder %s1688_s14, %s1684_s13 }
   0x6   : > { %p99_p1 = scmp.eq.s32.totalorder %s98_s20, 0  ;;  %p112_p2 = scmp.eq.s32.totalorder %s1741_s16, 1 }
   0x7   : > { %p117_p3 = scmp.ne.s32.totalorder %s1684_s13, %s1680_s12  ;;  %p118_p4 = scmp.eq.s32.totalorder %s1107_s17, 1 }
   0x8   : > { %s1756_s21 = scalar_select %p99_p1, %s1688_s14, %s101_s19  }
   0x9   : > { %p1758_p5 = por %p112_p2, %p111_p0  ;;  %p1762_p6 = por %p118_p4, %p117_p3 }
   0xa   : > { %p1110_p7 = scmp.ge.s32.totalorder %s1692_s15, 1  ;;  %p160_p8 = scmp.lt.s32.totalorder %s1692_s15, 3 }
   0xc   : > { %p161_p9 = pnand %p1110_p7, %p160_p8 }
   0xd   : > { %s1112_s24 = sshll.u32 (!%p161_p9), %s1741_s16, 4  ;;  %v1694_v0 = vmov (!%p161_p9), 0.0|0.0   ;;  %vm1695_vm0 = vmmov (!%p161_p9), 0   ;;  %v1696_v1 = vmov (!%p161_p9), 0.0   ;;  %vm256_vm1 = vcmask (!%p161_p9), 261120   ;;  %p204_p11 = scmp.lt.s32.totalorder (!%p161_p9), %s1741_s16, 1 }
   0xe   : > { %164 = sbr.rel (%p161_p9) target bundleno = 484 (0x1e4), region = 32  ;;  %1436 = vmatprep.subr.bf16.mxu0 (!%p161_p9), %v1694_v0  ;;  %p193_p10 = scmp.lt.s32.totalorder (!%p161_p9), %s1112_s24, 31  ;;  %1460 = vmatprep.subr.bf16.mxu1 (!%p161_p9), %v1694_v0  ;;  %vm1006_vm2 = vcmask (!%p161_p9), 1040384   ;;  %vm1008_vm3 = vcmask (!%p161_p9), 1041408   ;;  %vm1010_vm4 = vcmask (!%p161_p9), 1042432  }
   0xf   : > { %1258 = vmatprep.mubr.msk.f32.mxu0 (!%p161_p9), %vm1695_vm0, %v1696_v1  ;;  %1293 = vmatprep.mubr.msk.f32.mxu1 (!%p161_p9), %vm1695_vm0, %v1696_v1  ;;  %s189_s9 = sand.u32 (!%p161_p9), 1, %s1684_s13   ;;  %s1121_s11 = sshll.u32 (!%p161_p9), %s1741_s16, 6 }
  0x10   : > { %s1111_s10 = sshll.u32 (!%p161_p9), %s189_s9, 2  ;;  %s1014_s26 = scalar_lea.sflag (!%p161_p9), [#allocation3], %s189_s9 }
  0x11   : > { %s191_s17 = scalar_lea.vmem (!%p161_p9), [#allocation2], %s1111_s10  ;;  %s1699_s27 = smov (!%p161_p9), [#allocation2]  }
  0x12   : > { %s1027_s19 = sshll.u32 (!%p161_p9), %s191_s17, 4  ;;  %s2079_s19 = int_to_ptr.vmem [resolvable:$true] %s1027_s19 }
  0x15   : > { %s2130_s24 = smov (!%p193_p10, %s1112_s24), 31 }
  0x16   : > { %s1113_s25 = sshll.u32 %s2130_s24, 3 }
  0x17   : > { %s1778_s28 = scalar_lea.vmem %s2119_s0, %s1113_s25  ;;  %s1783_s4 = scalar_lea.vmem %s2120_s1, %s1113_s25 }
  0x18   : > { %v207_v2 = vld [vmem:[%s1778_s28] sm:$0xff]  ;;  %v208_v3 = vld [vmem:[%s1778_s28 + $0x8] sm:$0xff]  ;;  %v209_v7 = vld [vmem:[%s1778_s28 + $0x10] sm:$0xff]  ;;  %s205_s5 = scalar_select %p204_p11, %s1741_s16, 1 }
  0x19   : > { %v223_v4 = vld [vmem:[%s1783_s4] sm:$0xff]  ;;  %v224_v5 = vld [vmem:[%s1783_s4 + $0x8] sm:$0xff]  ;;  %v210_v8 = vld [vmem:[%s1778_s28 + $0x18] sm:$0xff]  ;;  %s2077_s25 = scalar_lea.hbm %s2122_s3, %s1121_s11  ;;  %s1630_s16 = scalar_lea.vmem %s2079_s19, 64 }
  0x1a   : > { %v240_v6 = vmul.f32 %v223_v4, %v207_v2  ;;  %v241_v9 = vmul.f32 %v224_v5, %v208_v3  ;;  %v225_v10 = vld [vmem:[%s1783_s4 + $0x10] sm:$0xff]  ;;  %v226_v11 = vld [vmem:[%s1783_s4 + $0x18] sm:$0xff]  ;;  %v211_v12 = vld [vmem:[%s1778_s28 + $0x20] sm:$0xff]  ;;  %s206_s8 = scalar_lea.vmem %s2121_s2, %s205_s5  ;;  %p1631_p12 = scmp.ne.s32.totalorder %s2079_s19, %s1630_s16 }
  0x1b   : > { %v242_v14 = vmul.f32 %v225_v10, %v209_v7  ;;  %v243_v15 = vmul.f32 %v226_v11, %v210_v8  ;;  %v212_v16 = vld [vmem:[%s1778_s28 + $0x28] sm:$0xff]  ;;  %v227_v17 = vld [vmem:[%s1783_s4 + $0x20] sm:$0xff]  ;;  %v213_v23 = vld [vmem:[%s1778_s28 + $0x30] sm:$0xff] }
  0x1c   : > { %v261_v13 = vsel %vm256_vm1, %v240_v6, 0  ;;  %v228_v18 = vld [vmem:[%s1783_s4 + $0x28] sm:$0xff]  ;;  %v264_v19 = vsel %vm256_vm1, %v241_v9, 0  ;;  %v244_v21 = vmul.f32 %v227_v17, %v211_v12  ;;  %v229_v24 = vld [vmem:[%s1783_s4 + $0x30] sm:$0xff]  ;;  %v214_v32 = vld [vmem:[%s1778_s28 + $0x38] sm:$0xff]  ;;  %p1632_p13 = pnand %p1631_p12, %p1758_p5 }
  0x1d   : > { %v309_v20 = vand.u32 4294901760, %v261_v13  ;;  %v245_v22 = vmul.f32 %v228_v18, %v212_v16  ;;  %v312_v25 = vand.u32 4294901760, %v264_v19  ;;  %v267_v26 = vsel %vm256_vm1, %v242_v14, 0  ;;  %v230_v33 = vld [vmem:[%s1783_s4 + $0x38] sm:$0xff]  ;;  %v215_v58 = vld [vmem:[%s1778_s28 + $0x40] sm:$0xff]  ;;  %v216_v62 = vld [vmem:[%s1778_s28 + $0x48] sm:$0xff] }
  0x1e   : > { %v270_v27 = vsel %vm256_vm1, %v243_v15, 0  ;;  %v315_v29 = vand.u32 4294901760, %v267_v26  ;;  %v273_v31 = vsel %vm256_vm1, %v244_v21, 0  ;;  %v246_v37 = vmul.f32 %v229_v24, %v213_v23  ;;  %v231_v63 = vld [vmem:[%s1783_s4 + $0x40] sm:$0xff]  ;;  %v232_v2 = vld [vmem:[%s1783_s4 + $0x48] sm:$0xff]  ;;  %v217_v15 = vld [vmem:[%s1778_s28 + $0x50] sm:$0xff]  ;;  %p1633_p0 = pneg %p1632_p13 }
  0x1f   : > { %v1803_v28 = vsub.f32 %v261_v13, %v309_v20  ;;  %v318_v30 = vand.u32 4294901760, %v270_v27  ;;  %v1808_v34 = vpack.c.bf16 %v312_v25, %v309_v20  ;;  %v1810_v35 = vsub.f32 %v264_v19, %v312_v25  ;;  %v233_v16 = vld [vmem:[%s1783_s4 + $0x50] sm:$0xff]  ;;  %v218_v19 = vld [vmem:[%s1778_s28 + $0x58] sm:$0xff] }
  0x20   : > { %v276_v36 = vsel %vm256_vm1, %v245_v22, 0  ;;  %v1813_v38 = vsub.f32 %v267_v26, %v315_v29  ;;  %v321_v41 = vand.u32 4294901760, %v273_v31  ;;  %v247_v44 = vmul.f32 %v230_v33, %v214_v32  ;;  %v234_v20 = vld [vmem:[%s1783_s4 + $0x58] sm:$0xff] }
  0x21   : > { %v1815_v39 = vsub.f32 %v270_v27, %v318_v30  ;;  %v402_v40 = vand.u32 4294901760, %v1803_v28  ;;  %1438 = vmatpush3.bf16.xpose.msra.mxu0 %v1808_v34  ;;  %v409_v42 = vand.u32 4294901760, %v1810_v35  ;;  %v324_v43 = vand.u32 4294901760, %v276_v36 }
  0x22   : > { %1439 = vmatprep.subr.bf16.mxu0 %v1694_v0  ;;  %v416_v46 = vand.u32 4294901760, %v1813_v38  ;;  %v1826_v48 = vpack.c.bf16 %v318_v30, %v315_v29  ;;  %v1831_v51 = vsub.f32 %v273_v31, %v321_v41  ;;  %v279_v52 = vsel %vm256_vm1, %v246_v37, 0  ;;  %v235_v37 = vld [vmem:[%s1783_s4 + $0x60] sm:$0xff] }
  0x23   : > { %v403_v45 = vsub.f32 %v1803_v28, %v402_v40  ;;  %v423_v47 = vand.u32 4294901760, %v1815_v39  ;;  %v410_v49 = vsub.f32 %v1810_v35, %v409_v42  ;;  %v282_v53 = vsel %vm256_vm1, %v247_v44, 0 }
  0x24   : > { %v1835_v55 = vsub.f32 %v276_v36, %v324_v43  ;;  %v417_v56 = vsub.f32 %v1813_v38, %v416_v46  ;;  %v327_v60 = vand.u32 4294901760, %v279_v52  ;;  %v330_v61 = vand.u32 4294901760, %v282_v53  ;;  %v219_v36 = vld [vmem:[%s1778_s28 + $0x60] sm:$0xff] }
  0x25   : > { %v404_v50 = vand.u32 4294901760, %v403_v45  ;;  %v411_v54 = vand.u32 4294901760, %v410_v49  ;;  %v424_v57 = vsub.f32 %v1815_v39, %v423_v47  ;;  %v430_v3 = vand.u32 4294901760, %v1831_v51  ;;  %v220_v49 = vld [vmem:[%s1778_s28 + $0x68] sm:$0xff] }
  0x26   : > { %v418_v4 = vand.u32 4294901760, %v417_v56  ;;  %v437_v6 = vand.u32 4294901760, %v1835_v55  ;;  %v248_v7 = vmul.f32 %v231_v63, %v215_v58  ;;  %v249_v8 = vmul.f32 %v232_v2, %v216_v62 }
  0x27   : > { %v1461_v59 = vpack.c.bf16 %v411_v54, %v404_v50  ;;  %v425_v5 = vand.u32 4294901760, %v424_v57  ;;  %v1852_v9 = vsub.f32 %v279_v52, %v327_v60  ;;  %v1854_v10 = vsub.f32 %v282_v53, %v330_v61  ;;  %v236_v50 = vld [vmem:[%s1783_s4 + $0x68] sm:$0xff] }
  0x28   : > { %v431_v11 = vsub.f32 %v1831_v51, %v430_v3  ;;  %v1859_v12 = vpack.c.bf16 %v324_v43, %v321_v41  ;;  %v438_v14 = vsub.f32 %v1835_v55, %v437_v6  ;;  %v285_v17 = vsel %vm256_vm1, %v248_v7, 0  ;;  %v221_v7 = vld [vmem:[%s1778_s28 + $0x70] sm:$0xff] }
  0x29   : > { %1441 = vmatpush3.bf16.xpose.msra.mxu0 %v1826_v48  ;;  %1462 = vmatpush3.bf16.xpose.msra.mxu1 %v1461_v59  ;;  %v1464_v13 = vpack.c.bf16 %v425_v5, %v418_v4  ;;  %v288_v18 = vsel %vm256_vm1, %v249_v8, 0  ;;  %v444_v21 = vand.u32 4294901760, %v1852_v9  ;;  %v451_v22 = vand.u32 4294901760, %v1854_v10  ;;  %v237_v8 = vld [vmem:[%s1783_s4 + $0x70] sm:$0xff] }
  0x2a   : > { %1442 = vmatprep.subr.bf16.mxu0 %v1694_v0  ;;  %1463 = vmatprep.subr.bf16.mxu1 %v1694_v0  ;;  %v432_v23 = vand.u32 4294901760, %v431_v11  ;;  %v250_v24 = vmul.f32 %v233_v16, %v217_v15  ;;  %v439_v25 = vand.u32 4294901760, %v438_v14  ;;  %v333_v26 = vand.u32 4294901760, %v285_v17 }
  0x2b   : > { %v336_v27 = vand.u32 4294901760, %v288_v18  ;;  %v251_v29 = vmul.f32 %v234_v20, %v218_v19  ;;  %v445_v30 = vsub.f32 %v1852_v9, %v444_v21  ;;  %v452_v31 = vsub.f32 %v1854_v10, %v451_v22 }
  0x2c   : > { %v1875_v32 = vpack.c.bf16 %v330_v61, %v327_v60  ;;  %v291_v33 = vsel %vm256_vm1, %v250_v24, 0  ;;  %v1467_v41 = vpack.c.bf16 %v439_v25, %v432_v23  ;;  %v1880_v43 = vsub.f32 %v285_v17, %v333_v26  ;;  %v222_v17 = vld [vmem:[%s1778_s28 + $0x78] sm:$0xff]  ;;  %s1634_s28 = sshll.u32 %s1699_s27, 4  ;;  %s1635_s28 = int_to_ptr.vmem [resolvable:$false] %s1634_s28 }
  0x2d   : > { %v1882_v44 = vsub.f32 %v288_v18, %v336_v27  ;;  %v294_v45 = vsel %vm256_vm1, %v251_v29, 0  ;;  %v446_v52 = vand.u32 4294901760, %v445_v30  ;;  %v453_v53 = vand.u32 4294901760, %v452_v31  ;;  %v238_v18 = vld [vmem:[%s1783_s4 + $0x78] sm:$0xff]  ;;  %s1636_s29 = scalar_lea.vmem %s1635_s28, 128  ;;  %p1637_p1 = scmp.lt.s32.totalorder %s2079_s19, %s1635_s28 }
  0x2e   : > { %v339_v54 = vand.u32 4294901760, %v291_v33  ;;  %v252_v56 = vmul.f32 %v235_v37, %v219_v36  ;;  %v342_v57 = vand.u32 4294901760, %v294_v45  ;;  %v458_v58 = vand.u32 4294901760, %v1880_v43  ;;  %p1638_p2 = scmp.lt.s32.totalorder %s1636_s29, %s1630_s16 }
  0x2f   : > { %v465_v59 = vand.u32 4294901760, %v1882_v44  ;;  %v253_v60 = vmul.f32 %v236_v50, %v220_v49  ;;  %v1892_v61 = vpack.c.bf16 %v336_v27, %v333_v26  ;;  %v1470_v62 = vpack.c.bf16 %v453_v53, %v446_v52 }
  0x30   : > { %v1894_v63 = vsub.f32 %v291_v33, %v339_v54  ;;  %v297_v2 = vsel %vm256_vm1, %v252_v56, 0  ;;  %v1901_v4 = vpack.c.bf16 %v409_v42, %v402_v40  ;;  %v1903_v5 = vsub.f32 %v294_v45, %v342_v57  ;;  %p1639_p3 = por %p1638_p2, %p1637_p1 }
  0x31   : > { %1444 = vmatpush3.bf16.xpose.msra.mxu0 %v1859_v12  ;;  %1465 = vmatpush3.bf16.xpose.msra.mxu1 %v1464_v13  ;;  %v1911_v11 = vpack.c.bf16 %v423_v47, %v416_v46  ;;  %v1915_v13 = vpack.c.bf16 %v437_v6, %v430_v3  ;;  %v1917_v14 = vpack.c.bf16 %v451_v22, %v444_v21  ;;  %v300_v42 = vsel %vm256_vm1, %v253_v60, 0 }
  0x32   : > { %1445 = vmatprep.subr.bf16.mxu0 %v1694_v0  ;;  %1466 = vmatprep.subr.bf16.mxu1 %v1694_v0  ;;  %v459_v15 = vsub.f32 %v1880_v43, %v458_v58  ;;  %v466_v40 = vsub.f32 %v1882_v44, %v465_v59  ;;  %v1922_v16 = vpack.c.bf16 %v465_v59, %v458_v58  ;;  %v345_v20 = vand.u32 4294901760, %v297_v2  ;;  %p1640_p4 = pnand %p1639_p3, %p1633_p0 }
  0x33   : > { %v254_v19 = vmul.f32 %v237_v8, %v221_v7  ;;  %v348_v46 = vand.u32 4294901760, %v300_v42  ;;  %v472_v47 = vand.u32 4294901760, %v1894_v63  ;;  %v479_v3 = vand.u32 4294901760, %v1903_v5 }
  0x34   : > { %v460_v6 = vand.u32 4294901760, %v459_v15  ;;  %v467_v21 = vand.u32 4294901760, %v466_v40  ;;  %v255_v22 = vmul.f32 %v238_v18, %v222_v17  ;;  %v1933_v24 = vpack.c.bf16 %v342_v57, %v339_v54 }
  0x35   : > { %v1931_v23 = vpack.c.bf16 %v479_v3, %v472_v47  ;;  %v1935_v25 = vsub.f32 %v297_v2, %v345_v20  ;;  %v1937_v26 = vsub.f32 %v300_v42, %v348_v46  ;;  %v303_v27 = vsel %vm256_vm1, %v254_v19, 0 }
  0x36   : > { %v1473_v29 = vpack.c.bf16 %v467_v21, %v460_v6  ;;  %v473_v30 = vsub.f32 %v1894_v63, %v472_v47  ;;  %v480_v31 = vsub.f32 %v1903_v5, %v479_v3  ;;  %v306_v33 = vsel %vm256_vm1, %v255_v22, 0 }
  0x37   : > { %v351_v36 = vand.u32 4294901760, %v303_v27  ;;  %v354_v37 = vand.u32 4294901760, %v306_v33  ;;  %v493_v45 = vand.u32 4294901760, %v1937_v26  ;;  %v1697_v56 = vmov 0  }
  0x38   : > { %v474_v49 = vand.u32 4294901760, %v473_v30  ;;  %v481_v50 = vand.u32 4294901760, %v480_v31  ;;  %v258_v57 = vsel %vm256_vm1, 1.0, %v1697_v56  ;;  %v1955_v58 = vpack.c.bf16 %v348_v46, %v345_v20 }
  0x39   : > { %1447 = vmatpush3.bf16.xpose.msra.mxu0 %v1875_v32  ;;  %1468 = vmatpush3.bf16.xpose.msra.mxu1 %v1467_v41  ;;  %v486_v41 = vand.u32 4294901760, %v1935_v25  ;;  %v1950_v53 = vsub.f32 %v303_v27, %v351_v36  ;;  %v1952_v54 = vsub.f32 %v306_v33, %v354_v37  ;;  %v1959_v2 = vsub.f32 %v258_v57, %v258_v57 }
  0x3a   : > { %1448 = vmatprep.subr.bf16.mxu0 %v1694_v0  ;;  %1469 = vmatprep.subr.bf16.mxu1 %v1694_v0  ;;  %v1476_v59 = vpack.c.bf16 %v481_v50, %v474_v49  ;;  %v1969_v18 = vpack.c.bf16 %v354_v37, %v351_v36  ;;  %v1485_v27 = vpack.c.bf16 %v1810_v35, %v1803_v28  ;;  %v1698_v30 = vmov 1.0  }
  0x3b   : > { %v1948_v52 = vpack.c.bf16 %v493_v45, %v486_v41  ;;  %v487_v60 = vsub.f32 %v1935_v25, %v486_v41  ;;  %v500_v7 = vand.u32 4294901760, %v1950_v53  ;;  %v507_v8 = vand.u32 4294901760, %v1952_v54 }
  0x3c   : > { %v391_v17 = vand.u32 4294901760, %v1959_v2  ;;  %v1491_v28 = vpack.c.bf16 %v1835_v55, %v1831_v51  ;;  %v1494_v35 = vpack.c.bf16 %v1854_v10, %v1852_v9  ;;  %v1503_v51 = vpack.c.bf16 %v1937_v26, %v1935_v25 }
  0x3d   : > { %v488_v15 = vand.u32 4294901760, %v487_v60  ;;  %v1966_v42 = vpack.c.bf16 %v507_v8, %v500_v7  ;;  %v501_v20 = vsub.f32 %v1950_v53, %v500_v7  ;;  %v508_v46 = vsub.f32 %v1952_v54, %v507_v8 }
  0x3e   : > { %v392_v47 = vsub.f32 %v1959_v2, %v391_v17  ;;  %v1506_v55 = vpack.c.bf16 %v1952_v54, %v1950_v53 }
  0x3f   : > { %v502_v3 = vand.u32 4294901760, %v501_v20  ;;  %v509_v6 = vand.u32 4294901760, %v508_v46 }
  0x40   : > { %v393_v21 = vand.u32 4294901760, %v392_v47 }
  0x41   : > { %1450 = vmatpush3.bf16.xpose.msra.mxu0 %v1892_v61  ;;  %1471 = vmatpush3.bf16.xpose.msra.mxu1 %v1470_v62  ;;  %v494_v62 = vsub.f32 %v1937_v26, %v493_v45  ;;  %v1482_v22 = vpack.c.bf16 %v509_v6, %v502_v3 }
  0x42   : > { %1451 = vmatprep.subr.bf16.mxu0 %v1694_v0  ;;  %1472 = vmatprep.subr.bf16.mxu1 %v1694_v0 }
  0x43   : > { %v495_v40 = vand.u32 4294901760, %v494_v62 }
  0x45   : > { %v1479_v19 = vpack.c.bf16 %v495_v40, %v488_v15 }
  0x49   : > { %1453 = vmatpush3.bf16.xpose.msra.mxu0 %v1933_v24  ;;  %1474 = vmatpush3.bf16.xpose.msra.mxu1 %v1473_v29  ;;  %v1488_v29 = vpack.c.bf16 %v1815_v39, %v1813_v38  ;;  %v1497_v38 = vpack.c.bf16 %v1882_v44, %v1880_v43  ;;  %v1500_v39 = vpack.c.bf16 %v1903_v5, %v1894_v63  ;;  %v951_v63 = vlaneseq  ;;  %v239_v5 = vld [vmem:[%s206_s8] sm:$0x1] }
  0x4a   : > { %1454 = vmatprep.subr.bf16.mxu0 %v1694_v0  ;;  %1475 = vmatprep.subr.bf16.mxu1 %v1694_v0 }
  0x51   : > { %1456 = vmatpush3.bf16.xpose.msra.mxu0 %v1955_v58  ;;  %1477 = vmatpush3.bf16.xpose.msra.mxu1 %v1476_v59 }
  0x52   : > { %1457 = vmatprep.subr.bf16.mxu0 %v1694_v0  ;;  %1478 = vmatprep.subr.bf16.mxu1 %v1694_v0 }
  0x59   : > { %1459 = vmatpush3.bf16.xpose.msra.mxu0 %v1969_v18  ;;  %1480 = vmatpush3.bf16.xpose.msra.mxu1 %v1479_v19 }
  0x5a   : > { %1481 = vmatprep.subr.bf16.mxu1 %v1694_v0  ;;  %1484 = vmatprep.subr.bf16.mxu0 %v1694_v0 }
  0x60   : > { %1259 = vmatmul.mubr.f32.vlgmr.msra.gmra.mrb[0].mxu0 %v393_v21 }
  0x61   : > { %1483 = vmatpush3.bf16.xpose.msra.mxu1 %v1482_v22  ;;  %1486 = vmatpush3.bf16.xpose.msra.mxu0 %v1485_v27 }
  0x62   : > { %1487 = vmatprep.subr.bf16.mxu0 %v1694_v0  ;;  %1508 = vmatprep.subr.bf16.mxu1 %v1694_v0 }
  0x63   : > { %1328 = vmatprep.mubr.msk.f32.mxu0 %vm1695_vm0, %v1696_v1 }
  0x68   : > { %1294 = vmatmul.mubr.msk.f32.vlgmr.msra.gmra.mrb[0].mxu1 %vm256_vm1, %v1698_v30 }
  0x69   : > { %1489 = vmatpush3.bf16.xpose.msra.mxu0 %v1488_v29  ;;  %1510 = vmatpush3.bf16.xpose.msra.mxu1 %v1808_v34 }
  0x6a   : > { %1490 = vmatprep.subr.bf16.mxu0 %v1694_v0  ;;  %1511 = vmatprep.subr.bf16.mxu1 %v1694_v0 }
  0x6b   : > { %1363 = vmatprep.mubr.msk.f32.mxu1 %vm1695_vm0, %v1696_v1 }
  0x71   : > { %1492 = vmatpush3.bf16.xpose.msra.mxu0 %v1491_v28  ;;  %1513 = vmatpush3.bf16.xpose.msra.mxu1 %v1826_v48 }
  0x72   : > { %1493 = vmatprep.subr.bf16.mxu0 %v1694_v0  ;;  %1514 = vmatprep.subr.bf16.mxu1 %v1694_v0 }
  0x79   : > { %1495 = vmatpush3.bf16.xpose.msra.mxu0 %v1494_v35  ;;  %1516 = vmatpush3.bf16.xpose.msra.mxu1 %v1859_v12 }
  0x7a   : > { %1496 = vmatprep.subr.bf16.mxu0 %v1694_v0  ;;  %1517 = vmatprep.subr.bf16.mxu1 %v1694_v0 }
  0x81   : > { %1498 = vmatpush3.bf16.xpose.msra.mxu0 %v1497_v38  ;;  %1519 = vmatpush3.bf16.xpose.msra.mxu1 %v1875_v32 }
  0x82   : > { %1499 = vmatprep.subr.bf16.mxu0 %v1694_v0  ;;  %1520 = vmatprep.subr.bf16.mxu1 %v1694_v0 }
  0x89   : > { %1501 = vmatpush3.bf16.xpose.msra.mxu0 %v1500_v39  ;;  %1522 = vmatpush3.bf16.xpose.msra.mxu1 %v1892_v61 }
  0x8a   : > { %1502 = vmatprep.subr.bf16.mxu0 %v1694_v0  ;;  %1523 = vmatprep.subr.bf16.mxu1 %v1694_v0 }
  0x91   : > { %1504 = vmatpush3.bf16.xpose.msra.mxu0 %v1503_v51  ;;  %1525 = vmatpush3.bf16.xpose.msra.mxu1 %v1933_v24 }
  0x92   : > { %1505 = vmatprep.subr.bf16.mxu0 %v1694_v0  ;;  %1526 = vmatprep.subr.bf16.mxu1 %v1694_v0 }
  0x99   : > { %1507 = vmatpush3.bf16.xpose.msra.mxu0 %v1506_v55  ;;  %1528 = vmatpush3.bf16.xpose.msra.mxu1 %v1955_v58 }
  0x9a   : > { %1529 = vmatprep.subr.bf16.mxu1 %v1694_v0  ;;  %1532 = vmatprep.subr.bf16.mxu0 %v1694_v0 }
  0xa0   : > { %1329 = vmatmul.mubr.f32.vlgmr.msra.gmra.mrb[2].mxu0 %v1959_v2 }
  0xa1   : > { %1531 = vmatpush3.bf16.xpose.msra.mxu1 %v1969_v18  ;;  %1534 = vmatpush3.bf16.xpose.msra.mxu0 %v1901_v4  ;;  %v952_v4 = vshrl.u32 %v951_v63, 7 }
  0xa2   : > { %1535 = vmatprep.subr.bf16.mxu0 %v1694_v0  ;;  %1556 = vmatprep.subr.bf16.mxu1 %v1694_v0 }
  0xa3   : > { %1398 = vmatprep.mubr.msk.f32.mxu0 %vm1695_vm0, %v1696_v1 }
  0xa8   : > { %1364 = vmatmul.mubr.f32.vlgmr.msra.gmra.mrb[2].mxu1 %v391_v17 }
  0xa9   : > { %1537 = vmatpush3.bf16.xpose.msra.mxu0 %v1911_v11  ;;  %1558 = vmatpush3.bf16.xpose.msra.mxu1 %v1808_v34  ;;  %v949_v11 = vadd.f32 15.5, %v239_v5 }
  0xaa   : > { %1538 = vmatprep.subr.bf16.mxu0 %v1694_v0  ;;  %1559 = vmatprep.subr.bf16.mxu1 %v1694_v0 }
  0xab   : > { %1433 = vmatprep.mubr.msk.f32.mxu1 %vm1695_vm0, %v1696_v1  ;;  %v950_v7 = vadd.f32 15.5, %v949_v11 }
  0xad   : > { %v977_v15 = vmul.f32 0.6931472, %v950_v7 }
  0xb1   : > { %1540 = vmatpush3.bf16.xpose.msra.mxu0 %v1915_v13  ;;  %1561 = vmatpush3.bf16.xpose.msra.mxu1 %v1826_v48  ;;  %v953_v13 = vcvt.s32.f32 %v952_v4 }
  0xb2   : > { %1541 = vmatprep.subr.bf16.mxu0 %v1694_v0  ;;  %1562 = vmatprep.subr.bf16.mxu1 %v1694_v0 }
  0xb9   : > { %1543 = vmatpush3.bf16.xpose.msra.mxu0 %v1917_v14  ;;  %1564 = vmatpush3.bf16.xpose.msra.mxu1 %v1859_v12  ;;  %v958_v14 = vsub.s32 0, %v952_v4 }
  0xba   : > { %1544 = vmatprep.subr.bf16.mxu0 %v1694_v0  ;;  %1565 = vmatprep.subr.bf16.mxu1 %v1694_v0 }
  0xc1   : > { %1546 = vmatpush3.bf16.xpose.msra.mxu0 %v1922_v16  ;;  %1567 = vmatpush3.bf16.xpose.msra.mxu1 %v1875_v32  ;;  %v954_v16 = vmul.f32 15.5, %v953_v13 }
  0xc2   : > { %1547 = vmatprep.subr.bf16.mxu0 %v1694_v0  ;;  %1568 = vmatprep.subr.bf16.mxu1 %v1694_v0 }
  0xc9   : > { %1549 = vmatpush3.bf16.xpose.msra.mxu0 %v1931_v23  ;;  %1570 = vmatpush3.bf16.xpose.msra.mxu1 %v1892_v61  ;;  %v959_v23 = vrot.slane %v949_v11, %v958_v14 }
  0xca   : > { %1550 = vmatprep.subr.bf16.mxu0 %v1694_v0  ;;  %1571 = vmatprep.subr.bf16.mxu1 %v1694_v0 }
  0xd1   : > { %1552 = vmatpush3.bf16.xpose.msra.mxu0 %v1948_v52  ;;  %1573 = vmatpush3.bf16.xpose.msra.mxu1 %v1933_v24  ;;  %v961_v24 = vadd.f32 %v959_v23, %v954_v16 }
  0xd2   : > { %1553 = vmatprep.subr.bf16.mxu0 %v1694_v0  ;;  %1574 = vmatprep.subr.bf16.mxu1 %v1694_v0 }
  0xd3   : > { %1624 = vrcp.f32 %v961_v24  ;;  %v1119_v37 = vadd.f32 -0.5, %v961_v24 }
  0xd4   : > { %1626 = vlog2.f32 %v961_v24 }
  0xd9   : > { %1555 = vmatpush3.bf16.xpose.msra.mxu0 %v1966_v42  ;;  %1576 = vmatpush3.bf16.xpose.msra.mxu1 %v1955_v58  ;;  %v978_v42 = vadd.f32 17.743313, %v977_v15 }
  0xda   : > { %1577 = vmatprep.subr.bf16.mxu1 %v1694_v0 }
  0xdb   : > { %v995_v6 = vrot.slane %v978_v42, %v958_v14 }
  0xdd   : > { %v1625_v25 = vpop.eup %1624 }
  0xde   : > { %v964_v26 = vmul.f32 %v1625_v25, %v1625_v25  ;;  %v1627_v33 = vpop.eup %1626 }
  0xdf   : > { %v972_v41 = vmul.f32 0.6931472, %v1627_v33 }
  0xe0   : > { %1399 = vmatmul.mubr.msk.f32.vlgmr.msra.gmra.mrb[4].mxu0 %vm256_vm1, %v1698_v30  ;;  %v965_v31 = vmul.f32 0.0007936508, %v964_v26 }
  0xe1   : > { %1579 = vmatpush3.bf16.xpose.msra.mxu1 %v1969_v18  ;;  %v973_v50 = vmul.f32 %v1119_v37, %v972_v41  ;;  %v983_v18 = vsub.f32 0.0, %v239_v5 }
  0xe2   : > { %v966_v36 = vsub.f32 0.0027777778, %v965_v31 }
  0xe3   : > { %v974_v56 = vsub.f32 %v973_v50, %v961_v24 }
  0xe4   : > { %v967_v49 = vmul.f32 %v966_v36, %v964_v26 }
  0xe5   : > { %v975_v59 = vadd.f32 0.9189385, %v974_v56 }
  0xe6   : > { %v968_v54 = vsub.f32 0.083333336, %v967_v49 }
  0xe8   : > { %1434 = vmatmul.mubr.msk.f32.vlgmr.msra.gmra.mrb[4].mxu1 %vm256_vm1, %v1698_v30  ;;  %v969_v58 = vmul.f32 %v1625_v25, %v968_v54 }
  0xea   : > { %v976_v8 = vadd.f32 %v975_v59, %v969_v58 }
  0xec   : > { %v980_v40 = vrot.slane %v976_v8, 1 }
  0xee   : > { %v982_v17 = vsub.f32 %v976_v8, %v980_v40 }
  0xf0   : > { %v988_v46 = vadd.f32 %v982_v17, %v978_v42  ;;  %v998_v21 = vrot.slane %v982_v17, 6 }
 0x133   : > { %v395_v1 = vpop.f32.mrb[0].mxu0 }
 0x134   : > { %v1260_v34 = vpop.f32.mrb[1].mxu0 }
 0x13b   : > { %v546_v48 = vpop.f32.mrb[0].mxu1 }
 0x13c   : > { %v547_v9 = vadd.f32 %v546_v48, %v395_v1  ;;  %v1295_v10 = vpop.f32.mrb[1].mxu1 }
 0x173   : > { %v650_v12 = vpop.f32.mrb[2].mxu0 }
 0x174   : > { %v651_v32 = vadd.f32 %v650_v12, %v547_v9  ;;  %v1330_v43 = vpop.f32.mrb[3].mxu0 }
 0x17b   : > { %v739_v44 = vpop.f32.mrb[2].mxu1 }
 0x17c   : > { %v740_v61 = vadd.f32 %v739_v44, %v651_v32  ;;  %v1365_v0 = vpop.f32.mrb[3].mxu1 }
 0x1b3   : > { %v858_v45 = vpop.f32.mrb[4].mxu0 }
 0x1b4   : > { %v859_v52 = vadd.f32 %v858_v45, %v740_v61  ;;  %v1400_v53 = vpop.f32.mrb[5].mxu0 }
 0x1bb   : > { %v945_v57 = vpop.f32.mrb[4].mxu1 }
 0x1bc   : > { %v946_v60 = vadd.f32 %v945_v57, %v859_v52  ;;  %v1435_v62 = vpop.f32.mrb[5].mxu1 }
 0x1be   : > { %v984_v2 = vadd.f32 1.0, %v946_v60 }
 0x1c0   : > { %1628 = vlog2.f32 %v984_v2 }
 0x1ca   : > { %v1629_v19 = vpop.eup %1628 }
 0x1cb   : > { %v986_v20 = vmul.f32 0.6931472, %v1629_v19 }
 0x1cd   : > { %v987_v47 = vmul.f32 %v986_v20, %v983_v18 }
 0x1cf   : > { %v989_v3 = vadd.f32 %v988_v46, %v987_v47  ;;  %v1004_v27 = vrot.slane %v987_v47, %v958_v14 }
 0x1d1   : > { %v990_v22 = vadd.f32 29.406033, %v989_v3 }
 0x1d3   : > { %v1007_v29 = vsel %vm1006_vm2, %v990_v22, %v995_v6 }
 0x1d4   : > { %v1009_v30 = vsel %vm1008_vm3, %v1007_v29, %v998_v21 }
 0x1d5   : > { %v1011_v28 = vsel %vm1010_vm4, %v1009_v30, %v1004_v27 }
 0x1d6   : > { %1012 = vst [vmem:[%s191_s17] sm:$0xf] %v1011_v28 }
 0x1d7   : > { %1643 = shalt.err (!%p1640_p4)
}
 0x1d8   : > { %s1644_s30 = scalar_lea.hbm %s2077_s25, 64  ;;  %s1648_s6 = scalar_lea.hbm %s2122_s3, 128 }
 0x1d9   : > { %p1645_p7 = scmp.ne.s32.totalorder %s2077_s25, %s1644_s30  ;;  %p1649_p10 = scmp.lt.u32.totalorder %s2077_s25, %s2122_s3 }
 0x1da   : > { %p1650_p11 = scmp.lt.u32.totalorder %s1648_s6, %s1644_s30  ;;  %p1652_p13 = scmp.lt.u32.totalorder %s1644_s30, %s2077_s25 }
 0x1db   : > { %p1646_p8 = pnand %p1645_p7, %p1758_p5 }
 0x1dc   : > { %p1651_p12 = por %p1650_p11, %p1649_p10 }
 0x1dd   : > { %p1647_p9 = pneg %p1646_p8 }
 0x1de   : > { %p1653_p0 = por %p1652_p13, %p1651_p12 }
 0x1e0   : > { %p1654_p1 = pnand %p1653_p0, %p1647_p9 }
 0x1e2   : > { %1657 = shalt.err (!%p1654_p1)
}
 0x1e3   : > { %1580 = dma.vmem_to_hbm [thread:$0]  (%p1758_p5), %s2079_s19, 64, %s2077_s25, %s1014_s26  }
 0x1e4 PF: > { %p1586_p2 = scmp.ge.s32.totalorder %s1692_s15, 2  ;;  %s1039_s9 = sand.u32 1, %s1680_s12  }
 0x1e5   : > { %s1040_s10 = scalar_lea.sflag [#allocation3], %s1039_s9 }
 0x1e6   : > { %p1583_p3 = pnand %p1586_p2, %p1762_p6 }
 0x1e8   : > { %1675 = dma.done.wait (!%p1583_p3), %s1040_s10, 64  }
 0x1e9   : > { %1677 = vsyncadd (!%p1583_p3), %s1040_s10, 4294967232  ;;  %p13_p4 = scmp.ge.s32.totalorder %s1745_s18, 4   ;;  %s2125_s12 = smov %s1684_s13 }
 0x1ea   : > { %s2126_s13 = smov %s1688_s14  ;;  %s2127_s14 = smov %s1756_s21 }
 0x1eb   : > { %s2128_s15 = smov %s1745_s18  ;;  %15 = sbr.rel (!%p13_p4) target bundleno = 3 (0x3), region = 73 }
 0x1f2   :  { %1045 = vsyncpa [#allocation3], 1 }
 0x1f3   :  { %1047 = vsyncpa [#allocation3 + $0x1], 1 }

</bundles_post_ra>
